<compile_context>
chip_gen: v7x
topology: tpu7x:2x2x1
jax: 0.10.0
libtpu: 0.0.40
codegen_flags: <defaults>
</compile_context>

<pallas_src>
import functools

import jax
import jax.numpy as jnp
from jax.experimental import pallas as pl
from jax.experimental.pallas import tpu as pltpu


def _round_up(x, m):
    return ((x + m - 1) // m) * m


# ---------------------------------------------------------------------------
# Fused kernel: prior head -> (implicit concat) -> posterior head
# ---------------------------------------------------------------------------
def _posterior_fused_kernel(x_ref, w_ref, b_ref, out_ref, *, meta):
    sa_pad = meta["sa_pad"]          # padded width of [s_prev | a]
    ls = meta["ls"]                  # 2 * s_dim  (real loc|scale width)
    ls_pad = meta["ls_pad"]
    h_pad = meta["h_pad"]
    h_off = meta["h_off"]            # lane-aligned offset of h inside x
    DIM = meta["DIM"]
    s_dim = ls // 2
    o_w1p = meta["o_w1p"]
    o_w1qls = meta["o_w1qls"]
    o_w1qh = meta["o_w1qh"]
    o_w2p = meta["o_w2p"]
    o_w2q = meta["o_w2q"]
    wt = w_ref.dtype                 # bf16
    f32 = jnp.float32

    def softplus(x):
        # matches PyTorch F.softplus(beta=1, threshold=20), numerically safe
        return jnp.where(x > 20.0, x, jnp.log1p(jnp.exp(jnp.minimum(x, 20.0))))

    # Static, aligned views into the packed slabs (zero-cost slices).
    x_sa = x_ref[:, 0:sa_pad]                  # (B, sa_pad)  [s_prev | a | 0...]
    h_in = x_ref[:, h_off:h_off + h_pad]       # (B, h_pad)   [h | 0...]

    b1p = b_ref[:, 0:DIM]                      # (1, DIM)
    b2p = b_ref[:, DIM:DIM + ls_pad]           # (1, ls_pad)
    b1q = b_ref[:, 2 * DIM:3 * DIM]            # (1, DIM)
    b2q = b_ref[:, 3 * DIM:4 * DIM]            # (1, DIM) zero-padded beyond ls

    # ---- prior head: fc1 over [s_prev | a] (single merged dot) ----
    h1 = jnp.dot(x_sa, w_ref[o_w1p:o_w1p + sa_pad, :],
                 preferred_element_type=f32) + b1p
    h1 = jnp.maximum(h1, 0.0)                                    # ReLU (f32)

    # merged loc/scale head: y_p = [loc_p | pre_scale_p]  (B, ls_pad)
    y_p = jnp.dot(h1.astype(wt), w_ref[o_w2p:o_w2p + DIM, 0:ls_pad],
                  preferred_element_type=f32) + b2p
    cols_p = jax.lax.broadcasted_iota(jnp.int32, y_p.shape, 1)
    x_p = jnp.where(cols_p < s_dim, y_p, softplus(y_p) + 0.1)    # [loc_p | scale_p]

    # ---- posterior head: fc1 over [loc_p | scale_p | h] as split dots ----
    # (pad columns of x_p hit zero weight rows -> contribute nothing)
    h2 = (jnp.dot(x_p.astype(wt), w_ref[o_w1qls:o_w1qls + ls_pad, :],
                  preferred_element_type=f32)
          + jnp.dot(h_in, w_ref[o_w1qh:o_w1qh + h_pad, :],
                    preferred_element_type=f32)
          + b1q)
    h2 = jnp.maximum(h2, 0.0)                                    # ReLU (f32)

    # merged loc/scale head, computed full-DIM wide so the store is lane-dense.
    y_q = jnp.dot(h2.astype(wt), w_ref[o_w2q:o_w2q + DIM, :],
                  preferred_element_type=f32) + b2q
    cols_q = jax.lax.broadcasted_iota(jnp.int32, y_q.shape, 1)
    out_ref[...] = jnp.where(cols_q < s_dim, y_q, softplus(y_q) + 0.1)


# ---------------------------------------------------------------------------
# Wrapper builder (weights/bias closed over -> single fused jitted program)
# ---------------------------------------------------------------------------
def build_posterior_forward(params):
    w, b, meta = params["w"], params["b"], params["meta"]
    s_dim = meta["ls"] // 2
    DIM = meta["DIM"]
    kernel = functools.partial(_posterior_fused_kernel, meta=meta)
    vmem = pl.BlockSpec(memory_space=pltpu.MemorySpace.VMEM)

    @jax.jit
    def forward(s_prev, a, h):
        B = s_prev.shape[0]
        # Pack activations into one slab: [s_prev | a | 0-pad to 128 | h | 0-pad].
        pad_sa = jnp.zeros((B, meta["h_off"] - meta["sa"]), s_prev.dtype)
        pad_h = jnp.zeros((B, meta["h_pad"] - meta["h_dim"]), s_prev.dtype)
        x_in = jnp.concatenate([s_prev, a, pad_sa, h, pad_h], axis=1).astype(w.dtype)

        flops = 2 * B * DIM * (meta["sa_pad"] + 2 * meta["ls_pad"]
                               + meta["h_pad"] + DIM)
        bytes_accessed = (x_in.size * x_in.dtype.itemsize
                          + w.size * w.dtype.itemsize
                          + b.size * 4 + B * DIM * 4)

        packed = pl.pallas_call(
            kernel,
            out_shape=jax.ShapeDtypeStruct((B, DIM), jnp.float32),
            in_specs=[vmem, vmem, vmem],
            out_specs=vmem,
            cost_estimate=pl.CostEstimate(
                flops=flops,
                transcendentals=2 * B * (meta["ls_pad"] + DIM),
                bytes_accessed=bytes_accessed),
        )(x_in, w, b)
        return packed[:, :s_dim], packed[:, s_dim:2 * s_dim]

    return forward


# ---------------------------------------------------------------------------
# Parameter construction / packing (done once, outside the hot path)
# ---------------------------------------------------------------------------
def _init_linear(key, in_f, out_f):
    """PyTorch-Linear-like deterministic init; weight stored as [in, out]."""
    kw, kb = jax.random.split(key)
    bound = 1.0 / jnp.sqrt(jnp.float32(in_f))
    w = jax.random.uniform(kw, (in_f, out_f), jnp.float32, -bound, bound)
    b = jax.random.uniform(kb, (out_f,), jnp.float32, -bound, bound)
    return w, b


def init_head_params(key, in_dim, s_dim, DIM):
    """Raw (PyTorch-equivalent, pre-transposed) params for one MLP head."""
    k1, k2, k3 = jax.random.split(key, 3)
    w1, b1 = _init_linear(k1, in_dim, DIM)
    w21, b21 = _init_linear(k2, DIM, s_dim)
    w22, b22 = _init_linear(k3, DIM, s_dim)
    return (w1, b1, w21, b21, w22, b22)


def pack_params(prior_raw, post_raw, s_dim, a_dim, h_dim, DIM,
                weight_dtype=jnp.bfloat16):
    """Repack everything into ONE bf16 weight slab + ONE f32 bias slab, with all
    in-kernel slice offsets on 16-sublane / 128-lane boundaries."""
    assert DIM % 128 == 0
    w1p, b1p, w21p, b21p, w22p, b22p = prior_raw
    w1q, b1q, w21q, b21q, w22q, b22q = post_raw

    sa = s_dim + a_dim
    ls = 2 * s_dim
    sa_pad = _round_up(sa, 16)
    ls_pad = _round_up(ls, 16)
    h_pad = _round_up(h_dim, 16)

    o_w1p = 0
    o_w1qls = o_w1p + sa_pad
    o_w1qh = o_w1qls + ls_pad
    o_w2p = o_w1qh + h_pad
    o_w2q = o_w2p + DIM
    n_rows = o_w2q + DIM

    slab = jnp.zeros((n_rows, DIM), jnp.float32)
    slab = slab.at[o_w1p:o_w1p + sa, :].set(w1p)                    # prior fc1
    slab = slab.at[o_w1qls:o_w1qls + ls, :].set(w1q[:ls])           # post fc1 (loc|scale part)
    slab = slab.at[o_w1qh:o_w1qh + h_dim, :].set(w1q[ls:])          # post fc1 (h part)
    slab = slab.at[o_w2p:o_w2p + DIM, :ls].set(
        jnp.concatenate([w21p, w22p], axis=1))                      # prior fc21|fc22 merged
    slab = slab.at[o_w2q:o_w2q + DIM, :ls].set(
        jnp.concatenate([w21q, w22q], axis=1))                      # post fc21|fc22 merged
    slab = slab.astype(weight_dtype)

    bias = jnp.zeros((1, 4 * DIM), jnp.float32)
    bias = bias.at[0, 0:DIM].set(b1p)
    bias = bias.at[0, DIM:DIM + ls].set(jnp.concatenate([b21p, b22p]))
    bias = bias.at[0, 2 * DIM:3 * DIM].set(b1q)
    bias = bias.at[0, 3 * DIM:3 * DIM + ls].set(jnp.concatenate([b21q, b22q]))

    meta = dict(sa=sa, sa_pad=sa_pad, ls=ls, ls_pad=ls_pad,
                h_dim=h_dim, h_pad=h_pad, DIM=DIM,
                h_off=_round_up(sa, 128),
                o_w1p=o_w1p, o_w1qls=o_w1qls, o_w1qh=o_w1qh,
                o_w2p=o_w2p, o_w2q=o_w2q)
    return dict(w=slab, b=bias, meta=meta)


# ---------------------------------------------------------------------------
# Pure-JAX f32 reference (mirrors the PyTorch module) for a sanity check
# ---------------------------------------------------------------------------
def _ref_head(x, raw):
    w1, b1, w21, b21, w22, b22 = raw
    h1 = jnp.maximum(x @ w1 + b1, 0.0)
    loc = h1 @ w21 + b21
    scale = jax.nn.softplus(h1 @ w22 + b22) + 0.1
    return loc, scale


def _ref_posterior(s_prev, a, h, prior_raw, post_raw):
    loc_p, scale_p = _ref_head(jnp.concatenate([s_prev, a], axis=1), prior_raw)
    x = jnp.concatenate([loc_p, scale_p, h], axis=1)
    return _ref_head(x, post_raw)


if __name__ == "__main__":
    # small shapes consistent with the module
    B, s_dim, a_dim, h_dim, DIM = 2, 8, 4, 32, 128

    key = jax.random.PRNGKey(0)
    k_prior, k_post, ks, ka, kh = jax.random.split(key, 5)

    prior_raw = init_head_params(k_prior, s_dim + a_dim, s_dim, DIM)
    post_raw = init_head_params(k_post, s_dim * 2 + h_dim, s_dim, DIM)
    params = pack_params(prior_raw, post_raw, s_dim, a_dim, h_dim, DIM)

    posterior_forward = build_posterior_forward(params)

    s_prev = jax.random.normal(ks, (B, s_dim), jnp.float32)
    a = jax.random.normal(ka, (B, a_dim), jnp.float32)
    h = jax.random.normal(kh, (B, h_dim), jnp.float32)

    loc, scale = posterior_forward(s_prev, a, h)
    jax.block_until_ready((loc, scale))

    # sanity checks
    assert loc.shape == (B, s_dim) and scale.shape == (B, s_dim)
    assert bool(jnp.all(scale > 0.1 - 1e-3))  # softplus >= 0, +0.1 offset

    loc_ref, scale_ref = _ref_posterior(s_prev, a, h, prior_raw, post_raw)
    assert bool(jnp.allclose(loc, loc_ref, atol=5e-2, rtol=5e-2)), \
        f"loc mismatch, max abs err = {jnp.max(jnp.abs(loc - loc_ref))}"
    assert bool(jnp.allclose(scale, scale_ref, atol=5e-2, rtol=5e-2)), \
        f"scale mismatch, max abs err = {jnp.max(jnp.abs(scale - scale_ref))}"

    print("KERNEL_OK")
</pallas_src>

<mosaic_0001>
module attributes {stable_mosaic.version = 11 : i64} {
  func.func @_posterior_fused_kernel(%arg0: memref<2x160xbf16, #tpu.memory_space<vmem>>, %arg1: memref<320x128xbf16, #tpu.memory_space<vmem>>, %arg2: memref<1x512xf32, #tpu.memory_space<vmem>>, %arg3: memref<2x128xf32, #tpu.memory_space<vmem>>) attributes {dimension_semantics = [], scalar_prefetch = 0 : i64, scratch_operands = 0 : i64, tpu.core_type = #tpu.core_type<tc>} {
    %c0 = arith.constant 0 : index
    %c0_0 = arith.constant 0 : index
    %0 = vector.load %arg0[%c0, %c0_0] : memref<2x160xbf16, #tpu.memory_space<vmem>>, vector<2x16xbf16>
    %c0_1 = arith.constant 0 : index
    %c128 = arith.constant 128 : index
    %1 = vector.load %arg0[%c0_1, %c128] : memref<2x160xbf16, #tpu.memory_space<vmem>>, vector<2x32xbf16>
    %c0_2 = arith.constant 0 : index
    %c0_3 = arith.constant 0 : index
    %2 = vector.load %arg2[%c0_2, %c0_3] : memref<1x512xf32, #tpu.memory_space<vmem>>, vector<1x128xf32>
    %c0_4 = arith.constant 0 : index
    %c128_5 = arith.constant 128 : index
    %3 = vector.load %arg2[%c0_4, %c128_5] : memref<1x512xf32, #tpu.memory_space<vmem>>, vector<1x16xf32>
    %c0_6 = arith.constant 0 : index
    %c256 = arith.constant 256 : index
    %4 = vector.load %arg2[%c0_6, %c256] : memref<1x512xf32, #tpu.memory_space<vmem>>, vector<1x128xf32>
    %c0_7 = arith.constant 0 : index
    %c384 = arith.constant 384 : index
    %5 = vector.load %arg2[%c0_7, %c384] : memref<1x512xf32, #tpu.memory_space<vmem>>, vector<1x128xf32>
    %c0_8 = arith.constant 0 : index
    %c0_9 = arith.constant 0 : index
    %6 = vector.load %arg1[%c0_8, %c0_9] : memref<320x128xbf16, #tpu.memory_space<vmem>>, vector<16x128xbf16>
    %cst = arith.constant dense<0.000000e+00> : vector<2x128xf32>
    %7 = tpu.matmul %0, %6, %cst {dimension_numbers = #tpu.dot_dimension_numbers<[1], [0], [0], [1], [0, 0, 1, 1], [], []>} : vector<2x16xbf16>, vector<16x128xbf16>, vector<2x128xf32> -> vector<2x128xf32>
    %8 = vector.broadcast %2 : vector<1x128xf32> to vector<2x128xf32>
    %9 = arith.addf %7, %8 : vector<2x128xf32>
    %cst_10 = arith.constant 0.000000e+00 : f32
    %10 = vector.broadcast %cst_10 : f32 to vector<2x128xf32>
    %11 = arith.maximumf %9, %10 : vector<2x128xf32>
    %12 = arith.truncf %11 : vector<2x128xf32> to vector<2x128xbf16>
    %c64 = arith.constant 64 : index
    %c0_11 = arith.constant 0 : index
    %13 = vector.load %arg1[%c64, %c0_11] : memref<320x128xbf16, #tpu.memory_space<vmem>>, vector<128x16xbf16>
    %cst_12 = arith.constant dense<0.000000e+00> : vector<2x16xf32>
    %14 = tpu.matmul %12, %13, %cst_12 {dimension_numbers = #tpu.dot_dimension_numbers<[1], [0], [0], [1], [0, 0, 1, 1], [], []>} : vector<2x128xbf16>, vector<128x16xbf16>, vector<2x16xf32> -> vector<2x16xf32>
    %15 = vector.broadcast %3 : vector<1x16xf32> to vector<2x16xf32>
    %16 = arith.addf %14, %15 : vector<2x16xf32>
    %17 = tpu.iota {dimensions = array<i32: 1>} : vector<2x16xi32>
    %c8_i32 = arith.constant 8 : i32
    %18 = vector.broadcast %c8_i32 : i32 to vector<2x16xi32>
    %19 = arith.cmpi slt, %17, %18 : vector<2x16xi32>
    %cst_13 = arith.constant 2.000000e+01 : f32
    %20 = vector.broadcast %cst_13 : f32 to vector<2x16xf32>
    %21 = arith.cmpf ogt, %16, %20 : vector<2x16xf32>
    %cst_14 = arith.constant 2.000000e+01 : f32
    %22 = vector.broadcast %cst_14 : f32 to vector<2x16xf32>
    %23 = arith.minimumf %16, %22 : vector<2x16xf32>
    %24 = math.exp %23 : vector<2x16xf32>
    %25 = math.log1p %24 : vector<2x16xf32>
    %26 = arith.select %21, %16, %25 : vector<2x16xi1>, vector<2x16xf32>
    %cst_15 = arith.constant 1.000000e-01 : f32
    %27 = vector.broadcast %cst_15 : f32 to vector<2x16xf32>
    %28 = arith.addf %26, %27 : vector<2x16xf32>
    %29 = arith.select %19, %16, %28 : vector<2x16xi1>, vector<2x16xf32>
    %30 = arith.truncf %29 : vector<2x16xf32> to vector<2x16xbf16>
    %c16 = arith.constant 16 : index
    %c0_16 = arith.constant 0 : index
    %31 = vector.load %arg1[%c16, %c0_16] : memref<320x128xbf16, #tpu.memory_space<vmem>>, vector<16x128xbf16>
    %cst_17 = arith.constant dense<0.000000e+00> : vector<2x128xf32>
    %32 = tpu.matmul %30, %31, %cst_17 {dimension_numbers = #tpu.dot_dimension_numbers<[1], [0], [0], [1], [0, 0, 1, 1], [], []>} : vector<2x16xbf16>, vector<16x128xbf16>, vector<2x128xf32> -> vector<2x128xf32>
    %c32 = arith.constant 32 : index
    %c0_18 = arith.constant 0 : index
    %33 = vector.load %arg1[%c32, %c0_18] : memref<320x128xbf16, #tpu.memory_space<vmem>>, vector<32x128xbf16>
    %cst_19 = arith.constant dense<0.000000e+00> : vector<2x128xf32>
    %34 = tpu.matmul %1, %33, %cst_19 {dimension_numbers = #tpu.dot_dimension_numbers<[1], [0], [0], [1], [0, 0, 1, 1], [], []>} : vector<2x32xbf16>, vector<32x128xbf16>, vector<2x128xf32> -> vector<2x128xf32>
    %35 = arith.addf %32, %34 : vector<2x128xf32>
    %36 = vector.broadcast %4 : vector<1x128xf32> to vector<2x128xf32>
    %37 = arith.addf %35, %36 : vector<2x128xf32>
    %cst_20 = arith.constant 0.000000e+00 : f32
    %38 = vector.broadcast %cst_20 : f32 to vector<2x128xf32>
    %39 = arith.maximumf %37, %38 : vector<2x128xf32>
    %40 = arith.truncf %39 : vector<2x128xf32> to vector<2x128xbf16>
    %c192 = arith.constant 192 : index
    %c0_21 = arith.constant 0 : index
    %41 = vector.load %arg1[%c192, %c0_21] : memref<320x128xbf16, #tpu.memory_space<vmem>>, vector<128x128xbf16>
    %cst_22 = arith.constant dense<0.000000e+00> : vector<2x128xf32>
    %42 = tpu.matmul %40, %41, %cst_22 {dimension_numbers = #tpu.dot_dimension_numbers<[1], [0], [0], [1], [0, 0, 1, 1], [], []>} : vector<2x128xbf16>, vector<128x128xbf16>, vector<2x128xf32> -> vector<2x128xf32>
    %43 = vector.broadcast %5 : vector<1x128xf32> to vector<2x128xf32>
    %44 = arith.addf %42, %43 : vector<2x128xf32>
    %45 = tpu.iota {dimensions = array<i32: 1>} : vector<2x128xi32>
    %c8_i32_23 = arith.constant 8 : i32
    %46 = vector.broadcast %c8_i32_23 : i32 to vector<2x128xi32>
    %47 = arith.cmpi slt, %45, %46 : vector<2x128xi32>
    %cst_24 = arith.constant 2.000000e+01 : f32
    %48 = vector.broadcast %cst_24 : f32 to vector<2x128xf32>
    %49 = arith.cmpf ogt, %44, %48 : vector<2x128xf32>
    %cst_25 = arith.constant 2.000000e+01 : f32
    %50 = vector.broadcast %cst_25 : f32 to vector<2x128xf32>
    %51 = arith.minimumf %44, %50 : vector<2x128xf32>
    %52 = math.exp %51 : vector<2x128xf32>
    %53 = math.log1p %52 : vector<2x128xf32>
    %54 = arith.select %49, %44, %53 : vector<2x128xi1>, vector<2x128xf32>
    %cst_26 = arith.constant 1.000000e-01 : f32
    %55 = vector.broadcast %cst_26 : f32 to vector<2x128xf32>
    %56 = arith.addf %54, %55 : vector<2x128xf32>
    %57 = arith.select %47, %44, %56 : vector<2x128xi1>, vector<2x128xf32>
    %c0_27 = arith.constant 0 : index
    %c0_28 = arith.constant 0 : index
    %58 = vector.load %arg3[%c0_27, %c0_28] : memref<2x128xf32, #tpu.memory_space<vmem>>, vector<2x128xf32>
    tpu.vector_store %arg3[%c0_27, %c0_28], %57 {strides = array<i32>} : memref<2x128xf32, #tpu.memory_space<vmem>>, vector<2x128xf32>,
    return
  }
}

</mosaic_0001>

<bundles_post_ra>
// kernel: forward.1
= control target key start
LH: loop header
LB: loop body
LE: loop exit
PB: predicated region body
PF: predicated region fallthrough
CT: control target
= control target key end

     0   :  { %8 = vsyncpa [#allocation3], 0  ;;  %s646_s12 = smov [#allocation2]   ;;  %s743_s0 = inlined_call_operand.vmem [shape: bf16[2,160], index: 0, kind: input, shape index: {}]   ;;  %s744_s1 = inlined_call_operand.hbm [shape: bf16[320,128], index: 1, kind: input, shape index: {}]   ;;  %s745_s2 = inlined_call_operand.vmem [shape: f32[1,512], index: 2, kind: input, shape index: {}]   ;;  %s746_s3 = inlined_call_operand.vmem [shape: f32[2,128], index: 3, kind: output, shape index: {}]  }
   0x1   :  { %s16_s13 = sshll.u32 %s646_s12, 4  ;;  %s622_s16 = scalar_lea.hbm %s744_s1, 2560  ;;  %s17_s13 = int_to_ptr.vmem [resolvable:$true] %s16_s13 }
   0x2   :  { %p623_p0 = scmp.ne.s32.totalorder %s744_s1, %s622_s16  ;;  %p626_p1 = scmp.lt.u32.totalorder %s622_s16, %s744_s1 }
   0x4   :  { %p628_p2 = pnand %p626_p1, %p623_p0 }
   0x6   :  { %631 = shalt.err (!%p628_p2)
}
   0x7   :  { %s632_s21 = scalar_lea.vmem %s17_s13, 2560  ;;  %p637_p4 = scmp.lt.s32.totalorder %s17_s13, %s17_s13 }
   0x8   :  { %p633_p3 = scmp.ne.s32.totalorder %s17_s13, %s632_s21  ;;  %p638_p5 = scmp.lt.s32.totalorder %s632_s21, %s632_s21 }
   0xa   :  { %p639_p6 = por %p638_p5, %p637_p4 }
   0xc   :  { %p640_p7 = pnand %p639_p6, %p633_p3 }
   0xe   :  { %643 = shalt.err (!%p640_p7)
}
   0xf   :  { %s647_s22 = smov 64   ;;  %s648_s23 = smov 4  }
  0x10   :  { %22 = dma.hbm_to_vmem [thread:$0]  %s744_s1, 2560, %s17_s13, [#allocation3], %s647_s22, %s647_s22, %s648_s23  }
  0x11   :  { %644 = dma.done.wait [#allocation3], 2560  }
  0x12   :  { %645 = vsyncadd [#allocation3], 4294964736  ;;  %v649_v0 = vmov 0.0   ;;  %vm650_vm0 = vmmov 0   ;;  %v594_v1 = vld [vmem:[#allocation2] sm:$0xff]   ;;  %vm49_vm1 = vcmask 130048   ;;  %v205_v34 = vlaneseq }
  0x13   :  { %529 = vmatprep.subr.bf16.mxu0 %v649_v0  ;;  %531 = vmatprep.mubr.msk.bf16.mxu0 %vm650_vm0, %v649_v0  ;;  %v29_v2 = vld [vmem:[%s743_s0] sm:$0x1]  ;;  %v596_v4 = vld [vmem:[#allocation2 + $0x28] sm:$0xff]   ;;  %v597_v5 = vld [vmem:[#allocation2 + $0x30] sm:$0xff]   ;;  %vm243_vm2 = vcmask 261120  }
  0x14   :  { %535 = vmatprep.subr.bf16.mxu1 %v649_v0  ;;  %551 = vmatprep.mubr.msk.bf16.mxu1 %vm650_vm0, %v649_v0  ;;  %v595_v3 = vld [vmem:[#allocation2 + $0x20] sm:$0xff]   ;;  %v598_v6 = vld [vmem:[#allocation2 + $0x38] sm:$0xff]   ;;  %v600_v8 = vld [vmem:[#allocation2 + $0x48] sm:$0xff]   ;;  %v717_v38 = vand.u32 127, %v205_v34 }
  0x15   :  { %530 = vmatpush3.bf16.msra.mxu0 %v594_v1  ;;  %536 = vmatpush3.bf16.msra.mxu1 %v595_v3  ;;  %v599_v7 = vld [vmem:[#allocation2 + $0x40] sm:$0xff]   ;;  %v601_v9 = vld [vmem:[#allocation2 + $0x50] sm:$0xff]   ;;  %v602_v10 = vld [vmem:[#allocation2 + $0x58] sm:$0xff]  }
  0x16   :  { %563 = vmatprep.subr.bf16.mxu0 %v649_v0  ;;  %537 = vmatprep.subr.bf16.mxu1 %v649_v0  ;;  %v477_v11 = vld [vmem:[%s745_s2] ss:$0 sm:$0xff]  ;;  %v603_v19 = vld [vmem:[#allocation2 + $0x10] sm:$0xff]   ;;  %v605_v20 = vld [vmem:[#allocation2 + $0x18] sm:$0xff]   ;;  %vm207_vm5 = vcmp.lt.s32.totalorder %v717_v38, 8 }
  0x17   :  { %v604_v21 = vld [vmem:[#allocation2 + $0x8] sm:$0xff]   ;;  %v30_v22 = vld [vmem:[%s743_s0 + $0x1] sm:$0x1]  ;;  %v608_v48 = vld [vmem:[#allocation2 + $0x70] sm:$0xff]  }
  0x18   :  { %532 = vmatmul.mubr.msk.bf16.vlgmr.msra.gmra.mrb[0].mxu0 %vm49_vm1, %v29_v2  ;;  %v480_v23 = vld [vmem:[%s745_s2 + $0x1] ss:$0 sm:$0xff]  ;;  %v607_v47 = vld [vmem:[#allocation2 + $0x68] sm:$0xff]   ;;  %v609_v49 = vld [vmem:[#allocation2 + $0x78] sm:$0xff]  }
  0x19   :  { %565 = vmatprep.mubr.msk.bf16.mxu0 %vm650_vm0, %v649_v0  ;;  %538 = vmatpush3.bf16.msra.mxu1 %v596_v4  ;;  %v606_v45 = vld [vmem:[#allocation2 + $0x60] sm:$0xff]   ;;  %v611_v51 = vld [vmem:[#allocation2 + $0x88] sm:$0xff]   ;;  %v612_v56 = vld [vmem:[#allocation2 + $0x90] sm:$0xff]  }
  0x1a   :  { %539 = vmatprep.subr.bf16.mxu1 %v649_v0  ;;  %564 = vmatpush3.bf16.msra.mxu0 %v604_v21  ;;  %v610_v50 = vld [vmem:[#allocation2 + $0x80] sm:$0xff]   ;;  %v613_v57 = vld [vmem:[#allocation2 + $0x98] sm:$0xff]  }
  0x1b   :  { %569 = vmatprep.subr.bf16.mxu0 %v649_v0  ;;  %v494_v58 = vld [vmem:[%s745_s2 + $0x2] ss:$0 sm:$0xff]  ;;  %v495_v4 = vld [vmem:[%s745_s2 + $0x3] ss:$0 sm:$0xff] }
  0x1d   :  { %540 = vmatpush3.bf16.msra.mxu1 %v597_v5 }
  0x1e   :  { %541 = vmatprep.subr.bf16.mxu1 %v649_v0 }
  0x21   :  { %542 = vmatpush3.bf16.msra.mxu1 %v598_v6 }
  0x22   :  { %543 = vmatprep.subr.bf16.mxu1 %v649_v0 }
  0x25   :  { %544 = vmatpush3.bf16.msra.mxu1 %v599_v7 }
  0x26   :  { %545 = vmatprep.subr.bf16.mxu1 %v649_v0 }
  0x29   :  { %546 = vmatpush3.bf16.msra.mxu1 %v600_v8 }
  0x2a   :  { %547 = vmatprep.subr.bf16.mxu1 %v649_v0 }
  0x2d   :  { %548 = vmatpush3.bf16.msra.mxu1 %v601_v9 }
  0x2e   :  { %549 = vmatprep.subr.bf16.mxu1 %v649_v0 }
  0x31   :  { %550 = vmatpush3.bf16.msra.mxu1 %v602_v10 }
  0x32   :  { %555 = vmatprep.subr.bf16.mxu1 %v649_v0 }
  0xeb   :  { %v87_v12 = vpop.f32.mrb[0].mxu0 }
  0xec   :  { %v88_v13 = vadd.f32 %v477_v11, %v87_v12  ;;  %v533_v14 = vpop.f32.mrb[1].mxu0 }
  0xed   :  { %v90_v15 = vpop.f32.mrb[2].mxu0 }
  0xee   :  { %v93_v16 = vmax.f32 %v88_v13, 0.0  ;;  %v534_v17 = vpop.f32.mrb[3].mxu0 }
  0xf0   :  { %v94_v18 = vpack.c.bf16 %v93_v16, %v93_v16 }
  0xf2   :  { %552 = vmatmul.mubr.bf16.vlgmr.msra.gmra.mrb[0].mxu1 %v94_v18 }
  0xf3   :  { %559 = vmatprep.mubr.msk.bf16.mxu1 %vm650_vm0, %v649_v0  ;;  %556 = vmatpush3.bf16.msra.mxu1 %v603_v19 }
  0xf4   :  { %557 = vmatprep.subr.bf16.mxu1 %v649_v0 }
  0xf7   :  { %558 = vmatpush3.bf16.msra.mxu1 %v605_v20 }
  0xfa   :  { %560 = vmatmul.mubr.msk.bf16.vlgmr.msra.gmra.mrb[4].mxu1 %vm243_vm2, %v30_v22 }
 0x1c5   :  { %v199_v24 = vpop.f32.mrb[0].mxu1 }
 0x1c6   :  { %v200_v25 = vadd.f32 %v480_v23, %v199_v24  ;;  %v553_v26 = vpop.f32.mrb[1].mxu1 }
 0x1c7   :  { %v202_v27 = vpop.f32.mrb[2].mxu1 }
 0x1c8   :  { %v209_v28 = vmin.f32 %v200_v25, 20.0  ;;  %v554_v29 = vpop.f32.mrb[3].mxu1  ;;  %vm208_vm4 = vcmp.gt.f32.partialorder %v200_v25, 20.0 }
 0x1ca   :  { %v210_v30 = vmul.f32 1.442695, %v209_v28 }
 0x1cc   :  { %614 = vpow2.f32 %v210_v30 }
 0x1cd   :  { %v281_v52 = vpop.f32.mrb[4].mxu1 }
 0x1ce   :  { %v561_v53 = vpop.f32.mrb[5].mxu1 }
 0x1cf   :  { %v284_v54 = vpop.f32.mrb[6].mxu1 }
 0x1d0   :  { %v562_v55 = vpop.f32.mrb[7].mxu1 }
 0x1d6   :  { %v615_v31 = vpop.eup %614 }
 0x1d7   :  { %v212_v32 = vadd.f32 1.0, %v615_v31  ;;  %v215_v33 = vmul.f32 -0.5, %v615_v31  ;;  %v218_v36 = vand.u32 2147483647, %v615_v31 }
 0x1d9   :  { %616 = vlog2.f32 %v212_v32  ;;  %v216_v35 = vadd.f32 1.0, %v215_v33  ;;  %vm219_vm3 = vcmp.lt.f32.partialorder %v218_v36, 0.0004427343 }
 0x1db   :  { %v217_v40 = vmul.f32 %v615_v31, %v216_v35 }
 0x1e3   :  { %v617_v37 = vpop.eup %616 }
 0x1e4   :  { %v214_v39 = vmul.f32 0.6931472, %v617_v37 }
 0x1e6   :  { %v220_v41 = vsel %vm219_vm3, %v217_v40, %v214_v39 }
 0x1e7   :  { %v221_v42 = vsel %vm208_vm4, %v200_v25, %v220_v41 }
 0x1e8   :  { %v222_v43 = vadd.f32 0.1, %v221_v42 }
 0x1ea   :  { %v223_v44 = vsel %vm207_vm5, %v200_v25, %v222_v43 }
 0x1eb   :  { %v224_v46 = vpack.c.bf16 %v223_v44, %v223_v44 }
 0x1ed   :  { %566 = vmatmul.mubr.msk.bf16.vlgmr.msra.gmra.mrb[4].mxu0 %vm49_vm1, %v224_v46 }
 0x1ee   :  { %570 = vmatpush3.bf16.msra.mxu0 %v606_v45  ;;  %585 = vmatprep.mubr.msk.bf16.mxu0 %vm650_vm0, %v649_v0 }
 0x1ef   :  { %571 = vmatprep.subr.bf16.mxu0 %v649_v0 }
 0x1f2   :  { %572 = vmatpush3.bf16.msra.mxu0 %v607_v47 }
 0x1f3   :  { %573 = vmatprep.subr.bf16.mxu0 %v649_v0 }
 0x1f6   :  { %574 = vmatpush3.bf16.msra.mxu0 %v608_v48 }
 0x1f7   :  { %575 = vmatprep.subr.bf16.mxu0 %v649_v0 }
 0x1fa   :  { %576 = vmatpush3.bf16.msra.mxu0 %v609_v49 }
 0x1fb   :  { %577 = vmatprep.subr.bf16.mxu0 %v649_v0 }
 0x1fe   :  { %578 = vmatpush3.bf16.msra.mxu0 %v610_v50 }
 0x1ff   :  { %579 = vmatprep.subr.bf16.mxu0 %v649_v0 }
 0x202   :  { %580 = vmatpush3.bf16.msra.mxu0 %v611_v51 }
 0x203   :  { %581 = vmatprep.subr.bf16.mxu0 %v649_v0 }
 0x206   :  { %582 = vmatpush3.bf16.msra.mxu0 %v612_v56 }
 0x207   :  { %583 = vmatprep.subr.bf16.mxu0 %v649_v0 }
 0x20a   :  { %584 = vmatpush3.bf16.msra.mxu0 %v613_v57 }
 0x2c0   :  { %v330_v59 = vpop.f32.mrb[4].mxu0 }
 0x2c1   :  { %v331_v60 = vadd.f32 %v330_v59, %v281_v52  ;;  %v567_v61 = vpop.f32.mrb[5].mxu0 }
 0x2c2   :  { %v333_v62 = vpop.f32.mrb[6].mxu0 }
 0x2c3   :  { %v342_v63 = vadd.f32 %v494_v58, %v331_v60  ;;  %v568_v1 = vpop.f32.mrb[7].mxu0 }
 0x2c5   :  { %v343_v2 = vmax.f32 %v342_v63, 0.0 }
 0x2c7   :  { %v344_v3 = vpack.c.bf16 %v343_v2, %v343_v2 }
 0x2c9   :  { %586 = vmatmul.mubr.bf16.vlgmr.msra.gmra.mrb[8].mxu0 %v344_v3 }
 0x39c   :  { %v449_v0 = vpop.f32.mrb[8].mxu0 }
 0x39d   :  { %v450_v5 = vadd.f32 %v495_v4, %v449_v0  ;;  %v587_v6 = vpop.f32.mrb[9].mxu0 }
 0x39e   :  { %v452_v7 = vpop.f32.mrb[10].mxu0 }
 0x39f   :  { %v456_v8 = vmin.f32 %v450_v5, 20.0  ;;  %v588_v9 = vpop.f32.mrb[11].mxu0  ;;  %vm455_vm7 = vcmp.gt.f32.partialorder %v450_v5, 20.0 }
 0x3a1   :  { %v457_v10 = vmul.f32 1.442695, %v456_v8 }
 0x3a3   :  { %618 = vpow2.f32 %v457_v10 }
 0x3ad   :  { %v619_v11 = vpop.eup %618 }
 0x3ae   :  { %v459_v12 = vadd.f32 1.0, %v619_v11  ;;  %v462_v13 = vmul.f32 -0.5, %v619_v11  ;;  %v465_v15 = vand.u32 2147483647, %v619_v11 }
 0x3b0   :  { %620 = vlog2.f32 %v459_v12  ;;  %v463_v14 = vadd.f32 1.0, %v462_v13  ;;  %vm466_vm6 = vcmp.lt.f32.partialorder %v465_v15, 0.0004427343 }
 0x3b2   :  { %v464_v18 = vmul.f32 %v619_v11, %v463_v14 }
 0x3ba   :  { %v621_v16 = vpop.eup %620 }
 0x3bb   :  { %v461_v17 = vmul.f32 0.6931472, %v621_v16 }
 0x3bd   :  { %v467_v19 = vsel %vm466_vm6, %v464_v18, %v461_v17 }
 0x3be   :  { %v468_v20 = vsel %vm455_vm7, %v450_v5, %v467_v19 }
 0x3bf   :  { %v469_v21 = vadd.f32 0.1, %v468_v20 }
 0x3c1   :  { %v470_v22 = vsel %vm207_vm5, %v450_v5, %v469_v21 }
 0x3c2   :  { %471 = vst [vmem:[%s746_s3] sm:$0x3] %v470_v22 }
 0x3c3   :  { %476 = vsyncpa [#allocation3], 1 }

</bundles_post_ra>
